<compile_context>
chip_gen: v6e
topology: v6e:2x2x1
jax: 0.10.0
libtpu: 0.0.40
codegen_flags: <defaults>
</compile_context>

<pallas_src>
import functools

import numpy as np
import jax
import jax.numpy as jnp
from jax.experimental import pallas as pl
from jax.experimental.pallas import tpu as pltpu


# ----------------------------------------------------------------------------
# Tree helpers (pure python ports of the PyTorch module's helpers).
# TODO(synk): _read_nodes_dmp reads a file; replaced by a hard-coded tree dict.
# ----------------------------------------------------------------------------
def _get_leaves_nodes(nodes):
    parents, children = set(), set()
    for node in nodes:
        parents.add(node)
        children.update(nodes[node])
    children.add(0)
    leaves = list(sorted(children - parents))
    all_nodes = children | parents
    return leaves, all_nodes


def _get_nodes_to_all_ancestors(nodes, root=1, ancestors=None):
    if ancestors is None:
        ancestors = {0: set()}
    if root not in ancestors:
        ancestors[root] = set()
    if root in nodes:
        for child in nodes[root]:
            if child not in ancestors:
                ancestors[child] = set()
            ancestors[child].update(ancestors[root])
            ancestors[child].add(root)
            _get_nodes_to_all_ancestors(nodes, root=child, ancestors=ancestors)
    return ancestors


def _get_nodes_to_leaves(nodes, root=1, mapping=None):
    if mapping is None:
        mapping = {0: [0]}
    mapping[root] = []
    if root in nodes:
        for child in nodes[root]:
            _get_nodes_to_leaves(nodes, root=child, mapping=mapping)
            mapping[root].extend(mapping[child])
    else:
        mapping[root].append(root)
    return mapping


def _round_up(v, m):
    return (v + m - 1) // m * m


# ----------------------------------------------------------------------------
# Deterministic parameter construction (mirrors KrakenNet.__init__ /
# MatrixLCANet._init_weights / MatrixRootToLeafSums._init_weights).
# All weights are kept in their "W @ x" (torch) orientation because the kernel
# dataflow is transposed (reads on lanes).
# ----------------------------------------------------------------------------
ALPHA = 0.01  # MatrixLCANet alpha used by KrakenNet


def build_params(key, kmer_length, num_channels):
    tree = {1: [2, 3], 2: [4, 5], 3: [6, 7]}
    leaves, nodes = _get_leaves_nodes(tree)            # leaves=[0,4,5,6,7]
    leaf_idx = {leaf: i for i, leaf in enumerate(leaves)}
    n_leaves, n_nodes = len(leaves), len(nodes)        # 5, 8

    k_conv, k_lin_w, k_lin_b = jax.random.split(key, 3)

    # Conv1d(4, C, K, bias=False): torch weight (C, 4, K).
    bound_conv = 1.0 / np.sqrt(4 * kmer_length)
    w_conv_torch = jax.random.uniform(
        k_conv, (num_channels, 4, kmer_length), jnp.float32,
        minval=-bound_conv, maxval=bound_conv)
    # (C, 4, K) -> (C, K, 4) -> (C, 4K): column index k*4+ch matches the
    # in-kernel window-matrix row order (tap-major, channel-minor).
    w_conv_t = jnp.transpose(w_conv_torch, (0, 2, 1)).reshape(
        num_channels, 4 * kmer_length)

    # Linear(C, n_nodes) with bias (torch weight is (n_nodes, C)).
    bound_lin = 1.0 / np.sqrt(num_channels)
    w_lin_torch = jax.random.uniform(
        k_lin_w, (n_nodes, num_channels), jnp.float32,
        minval=-bound_lin, maxval=bound_lin)
    b_lin = jax.random.uniform(
        k_lin_b, (n_nodes,), jnp.float32, minval=-bound_lin, maxval=bound_lin)

    # MatrixRootToLeafSums: Linear(n_nodes, n_leaves, bias=False).
    w_rtl = np.zeros((n_leaves, n_nodes), np.float32)
    node_leaf_mapping = _get_nodes_to_leaves(tree)
    for node, tips in node_leaf_mapping.items():
        for leaf in tips:
            w_rtl[leaf_idx[leaf], node] = 1.0

    # MatrixLCANet weights.
    w_l2a = np.zeros((n_nodes, n_leaves), np.float32)
    b_l2a = -10.0 * np.ones(n_nodes, np.float32)
    w_c2p = np.zeros((n_nodes, n_nodes), np.float32)
    b_c2p = -20.0 * np.ones(n_nodes, np.float32)
    w_n2a = np.zeros((n_nodes, n_nodes), np.float32)
    b_n2a = -10.0 * np.ones(n_nodes, np.float32)

    for node, tips in node_leaf_mapping.items():
        for leaf in tips:
            w_l2a[node, leaf_idx[leaf]] = 15.0
            b_l2a[leaf] = -10.0
    for node, children in tree.items():
        for child in children:
            w_c2p[node, child] = 15.0
    for leaf in leaf_idx:                      # diagonal-only part of product()
        w_c2p[leaf, leaf] = 15.0
        b_c2p[leaf] = -5.0
    node_ancestor_mapping = _get_nodes_to_all_ancestors(tree)
    for node in node_ancestor_mapping:
        if node == 0:
            b_n2a[0] = 10.0
            w_n2a[0, 1:] = -20.0
        else:
            w_n2a[node, node] = 20.0
        for anc in node_ancestor_mapping[node]:
            w_n2a[node, anc] = -30.0
    b_c2p[0] = 5.0
    for node in nodes:
        w_c2p[node, 0] = -15.0

    params = {
        # bf16 on the MXU path, f32 everywhere precision-sensitive.
        "w_conv_t": w_conv_t.astype(jnp.bfloat16),             # (C, 4K)
        "w_lin": jnp.asarray(w_lin_torch).astype(jnp.bfloat16),  # (n_nodes, C)
        "b_lin": jnp.asarray(b_lin).reshape(n_nodes, 1),
        "w_rtl": jnp.asarray(w_rtl),                           # (n_leaves, n_nodes)
        "w_l2a": jnp.asarray(w_l2a),                           # (n_nodes, n_leaves)
        "b_l2a": jnp.asarray(b_l2a).reshape(n_nodes, 1),
        "w_c2p": jnp.asarray(w_c2p),                           # (n_nodes, n_nodes)
        "b_c2p": jnp.asarray(b_c2p).reshape(n_nodes, 1),
        "w_n2a": jnp.asarray(w_n2a),                           # (n_nodes, n_nodes)
        "b_n2a": jnp.asarray(b_n2a).reshape(n_nodes, 1),
    }
    return params, n_leaves, n_nodes


# ----------------------------------------------------------------------------
# Pallas kernel: one program per block of bt reads.  Everything is transposed
# ("weight-stationary"): reads (and kmer positions) live on lanes, so all the
# tanh / affine / store work is lane-dense.
# ----------------------------------------------------------------------------
def kraken_kernel(x_ref, w_conv_ref, w_lin_ref, b_lin_ref,
                  w_rtl_ref, w_l2a_ref, b_l2a_ref,
                  w_c2p_ref, b_c2p_ref, w_n2a_ref, b_n2a_ref,
                  out_ref, *, kmer_length, alpha, bf16_tanh):
    K = kmer_length
    n_nodes, bt = out_ref.shape            # (8, bt)
    x = x_ref[0]                           # (4, L*bt) bf16, lane = pos*bt + read
    L = x.shape[1] // bt
    l_out = L - K + 1                      # number of kmer positions per read

    # im2col: K lane-ALIGNED tap slices (start k*bt, bt multiple of 128) stacked
    # along sublanes -> (4K, l_out*bt) window matrix, row order = k*4 + ch.
    win = jnp.concatenate(
        [x[:, k * bt:(k + l_out) * bt] for k in range(K)], axis=0)

    # Conv1d (no bias) as ONE MXU matmul: (C, 4K) @ (4K, l_out*bt).
    feat = jnp.dot(w_conv_ref[...], win,
                   preferred_element_type=jnp.float32)        # (C, l_out*bt)
    if bf16_tanh:
        # v6e/v7x: bf16 EUP/VPU; safe since feat is cast to bf16 right after.
        feat_b = 0.5 * (jnp.tanh(feat.astype(jnp.bfloat16)) + 1.0)
    else:
        feat_b = (0.5 * (jnp.tanh(feat) + 1.0)).astype(jnp.bfloat16)

    # linear_layer + tanh -> [0, 1]; bias broadcasts along lanes.
    taxa = jnp.dot(w_lin_ref[...], feat_b,
                   preferred_element_type=jnp.float32) + b_lin_ref[...]
    taxa = 0.5 * (jnp.tanh(taxa) + 1.0)                       # (n_nodes, l_out*bt)

    # Per-read sum over kmer positions: l_out lane-aligned slices, plain VPU
    # adds.  No padding rows, no iota/where mask.
    ta = taxa[:, 0:bt]
    for p in range(1, l_out):
        ta = ta + taxa[:, p * bt:(p + 1) * bt]                # (n_nodes, bt)

    # root-to-leaf sums (Linear, no bias) -- f32.
    rtl = jnp.dot(w_rtl_ref[...], ta,
                  preferred_element_type=jnp.float32)         # (n_leaves, bt)

    # MatrixLCANet (always f32: the *500/alpha scaling before tanh saturation
    # is rounding-sensitive).
    n_leaves = rtl.shape[0]
    row = jax.lax.broadcasted_iota(jnp.int32, (n_leaves, bt), 0)
    not_row0 = row != 0
    col_max = jnp.max(jnp.where(not_row0, rtl, -jnp.inf), axis=0, keepdims=True)
    z = 100.0 * ((rtl - (1.0 - alpha) * col_max) * (5.0 / alpha) - 1.0)
    z = 0.5 * (jnp.tanh(z) + 1.0)
    z = jnp.where(not_row0, z, 0.0)                           # X[:, 0] = 0

    z = 0.5 * (jnp.tanh(jnp.dot(w_l2a_ref[...], z,
                                preferred_element_type=jnp.float32)
                        + b_l2a_ref[...]) + 1.0)              # (n_nodes, bt)
    z = 0.5 * (jnp.tanh(jnp.dot(w_c2p_ref[...], z,
                                preferred_element_type=jnp.float32)
                        + b_c2p_ref[...]) + 1.0)
    z = jnp.dot(w_n2a_ref[...], z,
                preferred_element_type=jnp.float32) + b_n2a_ref[...]

    out_ref[...] = z                                          # (n_nodes, bt): lane-dense


def kraken_forward(x, params, *, kmer_length, alpha=ALPHA,
                   block_reads=256, bf16_tanh=False):
    """Fused KrakenNet forward.

    x: (N, 4, read_length) float (PyTorch Conv1d NCL layout).
    Returns (N, n_nodes) float32.

    block_reads: reads per grid step (rounded up to a multiple of 128 lanes).
      v6e: 512-1024 is fine (128 MiB VMEM).  v7x: keep 128-256 so the grid has
      >= 2 (even) steps for the two TensorCores and VMEM stays <= ~48 MiB.
    bf16_tanh: set True on v6e/v7x (bf16 EUP/VPU); keep False on v5e.
    """
    N, c_in, L = x.shape
    assert c_in == 4, "expected (N, 4, read_length) input"
    n_nodes = params["b_lin"].shape[0]

    # Block of reads per grid step: multiple of 128 lanes (v5e MXU/vreg);
    # l_out*bt is then automatically a multiple of 256 for the v6e/v7x MXU.
    bt = _round_up(min(block_reads, _round_up(N, 128)), 128)
    n_pad = _round_up(N, bt)
    n_blk = n_pad // bt

    # Layout change fused with the bf16 downcast (replaces the NCL->NLC pass):
    # (N_pad, 4, L) -> (n_blk, 4, L*bt) with lane index = position*bt + read.
    x = x.astype(jnp.bfloat16)
    if n_pad != N:
        x = jnp.pad(x, ((0, n_pad - N), (0, 0), (0, 0)))
    xb = x.reshape(n_blk, bt, 4, L).transpose(0, 2, 3, 1).reshape(
        n_blk, 4, L * bt)

    def full(arr):
        nd = arr.ndim
        return pl.BlockSpec(arr.shape, lambda n, _nd=nd: (0,) * _nd)

    kernel = functools.partial(kraken_kernel, kmer_length=kmer_length,
                               alpha=alpha, bf16_tanh=bf16_tanh)

    out = pl.pallas_call(
        kernel,
        # Reads on lanes -> lane-dense output stores; un-transposed below.
        out_shape=jax.ShapeDtypeStruct((n_nodes, n_pad), jnp.float32),
        grid=(n_blk,),
        in_specs=[
            # Lane-dense bf16 input block (one read-block per grid step).
            pl.BlockSpec((1, 4, L * bt), lambda n: (n, 0, 0)),
            full(params["w_conv_t"]),
            full(params["w_lin"]),
            full(params["b_lin"]),
            full(params["w_rtl"]),
            full(params["w_l2a"]),
            full(params["b_l2a"]),
            full(params["w_c2p"]),
            full(params["b_c2p"]),
            full(params["w_n2a"]),
            full(params["b_n2a"]),
        ],
        out_specs=pl.BlockSpec((n_nodes, bt), lambda n: (0, n)),
        compiler_params=pltpu.CompilerParams(
            dimension_semantics=("parallel",),    # megacore / v7x 2-TC sharding
            vmem_limit_bytes=32 * 1024 * 1024),   # safe on v5e/v7x; raise on v6e
    )(xb, params["w_conv_t"], params["w_lin"], params["b_lin"],
      params["w_rtl"], params["w_l2a"], params["b_l2a"],
      params["w_c2p"], params["b_c2p"], params["w_n2a"], params["b_n2a"])
    return out[:, :N].T                                       # (N, n_nodes)


# ----------------------------------------------------------------------------
# Pure-JAX reference (mirrors the PyTorch forward with the same bf16 matmul
# inputs as the kernel) for a correctness check.
# ----------------------------------------------------------------------------
def kraken_ref(x_ncl, p, *, kmer_length, alpha=ALPHA):
    x = jnp.transpose(x_ncl, (0, 2, 1)).astype(jnp.bfloat16)   # (N, L, 4)
    N, L, _ = x.shape
    l_out = L - kmer_length + 1
    win = jnp.concatenate(
        [x[:, k:k + l_out, :] for k in range(kmer_length)], axis=-1)  # (N,l_out,4K)
    feat = jnp.einsum("nlf,cf->nlc", win, p["w_conv_t"],
                      preferred_element_type=jnp.float32)
    feat = 0.5 * (jnp.tanh(feat) + 1.0)
    taxa = jnp.einsum("nlc,dc->nld", feat.astype(jnp.bfloat16), p["w_lin"],
                      preferred_element_type=jnp.float32) + p["b_lin"][:, 0]
    taxa = 0.5 * (jnp.tanh(taxa) + 1.0)
    ta = taxa.sum(axis=1)                                      # (N, n_nodes)
    rtl = ta @ p["w_rtl"].T                                    # (N, n_leaves)
    row_max = rtl[:, 1:].max(axis=1, keepdims=True)
    z = 100.0 * ((rtl - (1.0 - alpha) * row_max) * (5.0 / alpha) - 1.0)
    z = 0.5 * (jnp.tanh(z) + 1.0)
    z = z.at[:, 0].set(0.0)
    z = 0.5 * (jnp.tanh(z @ p["w_l2a"].T + p["b_l2a"][:, 0]) + 1.0)
    z = 0.5 * (jnp.tanh(z @ p["w_c2p"].T + p["b_c2p"][:, 0]) + 1.0)
    z = z @ p["w_n2a"].T + p["b_n2a"][:, 0]
    return z


if __name__ == "__main__":
    KMER_LENGTH = 5
    NUM_CHANNELS = 16
    READ_LENGTH = 16
    BATCH = 2

    key = jax.random.PRNGKey(0)
    k_params, k_x = jax.random.split(key)
    params, n_leaves, n_nodes = build_params(k_params, KMER_LENGTH,
                                             NUM_CHANNELS)

    # DNA-read-like input: (N, 4, read_length), PyTorch Conv1d layout.
    x = jax.random.uniform(k_x, (BATCH, 4, READ_LENGTH), jnp.float32)

    out = kraken_forward(x, params, kmer_length=KMER_LENGTH)
    out = jax.block_until_ready(out)

    ref = kraken_ref(x, params, kmer_length=KMER_LENGTH)
    assert out.shape == (BATCH, n_nodes), out.shape
    np.testing.assert_allclose(np.asarray(out), np.asarray(ref),
                               rtol=2e-3, atol=2e-2)
    print("KERNEL_OK")
</pallas_src>

<mosaic_0001>
module attributes {stable_mosaic.version = 11 : i64} {
  func.func @kraken_kernel(%arg0: i32, %arg1: memref<1x4x2048xbf16, #tpu.memory_space<vmem>>, %arg2: memref<16x20xbf16, #tpu.memory_space<vmem>>, %arg3: memref<8x16xbf16, #tpu.memory_space<vmem>>, %arg4: memref<8x1xf32, #tpu.memory_space<vmem>>, %arg5: memref<5x8xf32, #tpu.memory_space<vmem>>, %arg6: memref<8x5xf32, #tpu.memory_space<vmem>>, %arg7: memref<8x1xf32, #tpu.memory_space<vmem>>, %arg8: memref<8x8xf32, #tpu.memory_space<vmem>>, %arg9: memref<8x1xf32, #tpu.memory_space<vmem>>, %arg10: memref<8x8xf32, #tpu.memory_space<vmem>>, %arg11: memref<8x1xf32, #tpu.memory_space<vmem>>, %arg12: memref<8x128xf32, #tpu.memory_space<vmem>>) attributes {dimension_semantics = [#tpu.dimension_semantics<parallel>], iteration_bounds = array<i64: 1>, scalar_prefetch = 0 : i64, scratch_operands = 0 : i64, tpu.core_type = #tpu.core_type<tc>, window_params = [{transform_indices = @transform_0, window_bounds = array<i64: 1, 4, 2048>}, {pipeline_mode = #tpu.pipeline_mode<synchronous>, transform_indices = @transform_1, window_bounds = array<i64: 16, 20>}, {pipeline_mode = #tpu.pipeline_mode<synchronous>, transform_indices = @transform_2, window_bounds = array<i64: 8, 16>}, {pipeline_mode = #tpu.pipeline_mode<synchronous>, transform_indices = @transform_3, window_bounds = array<i64: 8, 1>}, {pipeline_mode = #tpu.pipeline_mode<synchronous>, transform_indices = @transform_4, window_bounds = array<i64: 5, 8>}, {pipeline_mode = #tpu.pipeline_mode<synchronous>, transform_indices = @transform_5, window_bounds = array<i64: 8, 5>}, {pipeline_mode = #tpu.pipeline_mode<synchronous>, transform_indices = @transform_6, window_bounds = array<i64: 8, 1>}, {pipeline_mode = #tpu.pipeline_mode<synchronous>, transform_indices = @transform_7, window_bounds = array<i64: 8, 8>}, {pipeline_mode = #tpu.pipeline_mode<synchronous>, transform_indices = @transform_8, window_bounds = array<i64: 8, 1>}, {pipeline_mode = #tpu.pipeline_mode<synchronous>, transform_indices = @transform_9, window_bounds = array<i64: 8, 8>}, {pipeline_mode = #tpu.pipeline_mode<synchronous>, transform_indices = @transform_10, window_bounds = array<i64: 8, 1>}, {transform_indices = @transform_11, window_bounds = array<i64: 8, 128>}]} {
    %c0 = arith.constant 0 : index
    %c0_0 = arith.constant 0 : index
    %c0_1 = arith.constant 0 : index
    %0 = vector.load %arg1[%c0, %c0_0, %c0_1] : memref<1x4x2048xbf16, #tpu.memory_space<vmem>>, vector<1x4x2048xbf16>
    %1 = vector.shape_cast %0 : vector<1x4x2048xbf16> to vector<4x2048xbf16>
    %2 = vector.extract_strided_slice %1 {offsets = [0, 0], sizes = [4, 1536], strides = [1, 1]} : vector<4x2048xbf16> to vector<4x1536xbf16>
    %3 = vector.extract_strided_slice %1 {offsets = [0, 128], sizes = [4, 1536], strides = [1, 1]} : vector<4x2048xbf16> to vector<4x1536xbf16>
    %4 = vector.extract_strided_slice %1 {offsets = [0, 256], sizes = [4, 1536], strides = [1, 1]} : vector<4x2048xbf16> to vector<4x1536xbf16>
    %5 = vector.extract_strided_slice %1 {offsets = [0, 384], sizes = [4, 1536], strides = [1, 1]} : vector<4x2048xbf16> to vector<4x1536xbf16>
    %6 = vector.extract_strided_slice %1 {offsets = [0, 512], sizes = [4, 1536], strides = [1, 1]} : vector<4x2048xbf16> to vector<4x1536xbf16>
    %7 = tpu.concatenate %2, %3, %4, %5, %6 in 0 : vector<4x1536xbf16>, vector<4x1536xbf16>, vector<4x1536xbf16>, vector<4x1536xbf16>, vector<4x1536xbf16> -> vector<20x1536xbf16>
    %c0_2 = arith.constant 0 : index
    %c0_3 = arith.constant 0 : index
    %8 = vector.load %arg2[%c0_2, %c0_3] : memref<16x20xbf16, #tpu.memory_space<vmem>>, vector<16x20xbf16>
    %cst = arith.constant dense<0.000000e+00> : vector<16x1536xf32>
    %9 = tpu.matmul %8, %7, %cst {dimension_numbers = #tpu.dot_dimension_numbers<[1], [0], [0], [1], [0, 0, 1, 1], [], []>} : vector<16x20xbf16>, vector<20x1536xbf16>, vector<16x1536xf32> -> vector<16x1536xf32>
    %10 = math.tanh %9 : vector<16x1536xf32>
    %cst_4 = arith.constant 1.000000e+00 : f32
    %11 = vector.broadcast %cst_4 : f32 to vector<16x1536xf32>
    %12 = arith.addf %10, %11 : vector<16x1536xf32>
    %cst_5 = arith.constant 5.000000e-01 : f32
    %13 = vector.broadcast %cst_5 : f32 to vector<16x1536xf32>
    %14 = arith.mulf %13, %12 : vector<16x1536xf32>
    %15 = arith.truncf %14 : vector<16x1536xf32> to vector<16x1536xbf16>
    %c0_6 = arith.constant 0 : index
    %c0_7 = arith.constant 0 : index
    %16 = vector.load %arg3[%c0_6, %c0_7] : memref<8x16xbf16, #tpu.memory_space<vmem>>, vector<8x16xbf16>
    %cst_8 = arith.constant dense<0.000000e+00> : vector<8x1536xf32>
    %17 = tpu.matmul %16, %15, %cst_8 {dimension_numbers = #tpu.dot_dimension_numbers<[1], [0], [0], [1], [0, 0, 1, 1], [], []>} : vector<8x16xbf16>, vector<16x1536xbf16>, vector<8x1536xf32> -> vector<8x1536xf32>
    %c0_9 = arith.constant 0 : index
    %c0_10 = arith.constant 0 : index
    %18 = vector.load %arg4[%c0_9, %c0_10] : memref<8x1xf32, #tpu.memory_space<vmem>>, vector<8x1xf32>
    %19 = vector.broadcast %18 : vector<8x1xf32> to vector<8x1536xf32>
    %20 = arith.addf %17, %19 : vector<8x1536xf32>
    %21 = math.tanh %20 : vector<8x1536xf32>
    %cst_11 = arith.constant 1.000000e+00 : f32
    %22 = vector.broadcast %cst_11 : f32 to vector<8x1536xf32>
    %23 = arith.addf %21, %22 : vector<8x1536xf32>
    %cst_12 = arith.constant 5.000000e-01 : f32
    %24 = vector.broadcast %cst_12 : f32 to vector<8x1536xf32>
    %25 = arith.mulf %24, %23 : vector<8x1536xf32>
    %26 = vector.extract_strided_slice %25 {offsets = [0, 0], sizes = [8, 128], strides = [1, 1]} : vector<8x1536xf32> to vector<8x128xf32>
    %27 = vector.extract_strided_slice %25 {offsets = [0, 128], sizes = [8, 128], strides = [1, 1]} : vector<8x1536xf32> to vector<8x128xf32>
    %28 = arith.addf %26, %27 : vector<8x128xf32>
    %29 = vector.extract_strided_slice %25 {offsets = [0, 256], sizes = [8, 128], strides = [1, 1]} : vector<8x1536xf32> to vector<8x128xf32>
    %30 = arith.addf %28, %29 : vector<8x128xf32>
    %31 = vector.extract_strided_slice %25 {offsets = [0, 384], sizes = [8, 128], strides = [1, 1]} : vector<8x1536xf32> to vector<8x128xf32>
    %32 = arith.addf %30, %31 : vector<8x128xf32>
    %33 = vector.extract_strided_slice %25 {offsets = [0, 512], sizes = [8, 128], strides = [1, 1]} : vector<8x1536xf32> to vector<8x128xf32>
    %34 = arith.addf %32, %33 : vector<8x128xf32>
    %35 = vector.extract_strided_slice %25 {offsets = [0, 640], sizes = [8, 128], strides = [1, 1]} : vector<8x1536xf32> to vector<8x128xf32>
    %36 = arith.addf %34, %35 : vector<8x128xf32>
    %37 = vector.extract_strided_slice %25 {offsets = [0, 768], sizes = [8, 128], strides = [1, 1]} : vector<8x1536xf32> to vector<8x128xf32>
    %38 = arith.addf %36, %37 : vector<8x128xf32>
    %39 = vector.extract_strided_slice %25 {offsets = [0, 896], sizes = [8, 128], strides = [1, 1]} : vector<8x1536xf32> to vector<8x128xf32>
    %40 = arith.addf %38, %39 : vector<8x128xf32>
    %41 = vector.extract_strided_slice %25 {offsets = [0, 1024], sizes = [8, 128], strides = [1, 1]} : vector<8x1536xf32> to vector<8x128xf32>
    %42 = arith.addf %40, %41 : vector<8x128xf32>
    %43 = vector.extract_strided_slice %25 {offsets = [0, 1152], sizes = [8, 128], strides = [1, 1]} : vector<8x1536xf32> to vector<8x128xf32>
    %44 = arith.addf %42, %43 : vector<8x128xf32>
    %45 = vector.extract_strided_slice %25 {offsets = [0, 1280], sizes = [8, 128], strides = [1, 1]} : vector<8x1536xf32> to vector<8x128xf32>
    %46 = arith.addf %44, %45 : vector<8x128xf32>
    %47 = vector.extract_strided_slice %25 {offsets = [0, 1408], sizes = [8, 128], strides = [1, 1]} : vector<8x1536xf32> to vector<8x128xf32>
    %48 = arith.addf %46, %47 : vector<8x128xf32>
    %c0_13 = arith.constant 0 : index
    %c0_14 = arith.constant 0 : index
    %49 = vector.load %arg5[%c0_13, %c0_14] : memref<5x8xf32, #tpu.memory_space<vmem>>, vector<5x8xf32>
    %cst_15 = arith.constant dense<0.000000e+00> : vector<5x128xf32>
    %50 = tpu.matmul %49, %48, %cst_15 {dimension_numbers = #tpu.dot_dimension_numbers<[1], [0], [0], [1], [0, 0, 1, 1], [], []>} : vector<5x8xf32>, vector<8x128xf32>, vector<5x128xf32> -> vector<5x128xf32>
    %51 = tpu.iota {dimensions = array<i32: 0>} : vector<5x128xi32>
    %c0_i32 = arith.constant 0 : i32
    %52 = vector.broadcast %c0_i32 : i32 to vector<5x128xi32>
    %53 = arith.cmpi ne, %51, %52 : vector<5x128xi32>
    %cst_16 = arith.constant 0xFF800000 : f32
    %54 = vector.broadcast %cst_16 : f32 to vector<5x128xf32>
    %55 = arith.select %53, %50, %54 : vector<5x128xi1>, vector<5x128xf32>
    %cst_17 = arith.constant dense<0xFF800000> : vector<128xf32>
    %56 = vector.multi_reduction <maximumf>, %55, %cst_17 [0] : vector<5x128xf32> to vector<128xf32>
    %57 = vector.shape_cast %56 : vector<128xf32> to vector<1x128xf32>
    %cst_18 = arith.constant 9.900000e-01 : f32
    %58 = vector.broadcast %cst_18 : f32 to vector<1x128xf32>
    %59 = arith.mulf %58, %57 : vector<1x128xf32>
    %60 = vector.broadcast %59 : vector<1x128xf32> to vector<5x128xf32>
    %61 = arith.subf %50, %60 : vector<5x128xf32>
    %cst_19 = arith.constant 5.000000e+02 : f32
    %62 = vector.broadcast %cst_19 : f32 to vector<5x128xf32>
    %63 = arith.mulf %61, %62 : vector<5x128xf32>
    %cst_20 = arith.constant 1.000000e+00 : f32
    %64 = vector.broadcast %cst_20 : f32 to vector<5x128xf32>
    %65 = arith.subf %63, %64 : vector<5x128xf32>
    %cst_21 = arith.constant 1.000000e+02 : f32
    %66 = vector.broadcast %cst_21 : f32 to vector<5x128xf32>
    %67 = arith.mulf %66, %65 : vector<5x128xf32>
    %68 = math.tanh %67 : vector<5x128xf32>
    %cst_22 = arith.constant 1.000000e+00 : f32
    %69 = vector.broadcast %cst_22 : f32 to vector<5x128xf32>
    %70 = arith.addf %68, %69 : vector<5x128xf32>
    %cst_23 = arith.constant 5.000000e-01 : f32
    %71 = vector.broadcast %cst_23 : f32 to vector<5x128xf32>
    %72 = arith.mulf %71, %70 : vector<5x128xf32>
    %cst_24 = arith.constant 0.000000e+00 : f32
    %73 = vector.broadcast %cst_24 : f32 to vector<5x128xf32>
    %74 = arith.select %53, %72, %73 : vector<5x128xi1>, vector<5x128xf32>
    %c0_25 = arith.constant 0 : index
    %c0_26 = arith.constant 0 : index
    %75 = vector.load %arg6[%c0_25, %c0_26] : memref<8x5xf32, #tpu.memory_space<vmem>>, vector<8x5xf32>
    %cst_27 = arith.constant dense<0.000000e+00> : vector<8x128xf32>
    %76 = tpu.matmul %75, %74, %cst_27 {dimension_numbers = #tpu.dot_dimension_numbers<[1], [0], [0], [1], [0, 0, 1, 1], [], []>} : vector<8x5xf32>, vector<5x128xf32>, vector<8x128xf32> -> vector<8x128xf32>
    %c0_28 = arith.constant 0 : index
    %c0_29 = arith.constant 0 : index
    %77 = vector.load %arg7[%c0_28, %c0_29] : memref<8x1xf32, #tpu.memory_space<vmem>>, vector<8x1xf32>
    %78 = vector.broadcast %77 : vector<8x1xf32> to vector<8x128xf32>
    %79 = arith.addf %76, %78 : vector<8x128xf32>
    %80 = math.tanh %79 : vector<8x128xf32>
    %cst_30 = arith.constant 1.000000e+00 : f32
    %81 = vector.broadcast %cst_30 : f32 to vector<8x128xf32>
    %82 = arith.addf %80, %81 : vector<8x128xf32>
    %cst_31 = arith.constant 5.000000e-01 : f32
    %83 = vector.broadcast %cst_31 : f32 to vector<8x128xf32>
    %84 = arith.mulf %83, %82 : vector<8x128xf32>
    %c0_32 = arith.constant 0 : index
    %c0_33 = arith.constant 0 : index
    %85 = vector.load %arg8[%c0_32, %c0_33] : memref<8x8xf32, #tpu.memory_space<vmem>>, vector<8x8xf32>
    %cst_34 = arith.constant dense<0.000000e+00> : vector<8x128xf32>
    %86 = tpu.matmul %85, %84, %cst_34 {dimension_numbers = #tpu.dot_dimension_numbers<[1], [0], [0], [1], [0, 0, 1, 1], [], []>} : vector<8x8xf32>, vector<8x128xf32>, vector<8x128xf32> -> vector<8x128xf32>
    %c0_35 = arith.constant 0 : index
    %c0_36 = arith.constant 0 : index
    %87 = vector.load %arg9[%c0_35, %c0_36] : memref<8x1xf32, #tpu.memory_space<vmem>>, vector<8x1xf32>
    %88 = vector.broadcast %87 : vector<8x1xf32> to vector<8x128xf32>
    %89 = arith.addf %86, %88 : vector<8x128xf32>
    %90 = math.tanh %89 : vector<8x128xf32>
    %cst_37 = arith.constant 1.000000e+00 : f32
    %91 = vector.broadcast %cst_37 : f32 to vector<8x128xf32>
    %92 = arith.addf %90, %91 : vector<8x128xf32>
    %cst_38 = arith.constant 5.000000e-01 : f32
    %93 = vector.broadcast %cst_38 : f32 to vector<8x128xf32>
    %94 = arith.mulf %93, %92 : vector<8x128xf32>
    %c0_39 = arith.constant 0 : index
    %c0_40 = arith.constant 0 : index
    %95 = vector.load %arg10[%c0_39, %c0_40] : memref<8x8xf32, #tpu.memory_space<vmem>>, vector<8x8xf32>
    %cst_41 = arith.constant dense<0.000000e+00> : vector<8x128xf32>
    %96 = tpu.matmul %95, %94, %cst_41 {dimension_numbers = #tpu.dot_dimension_numbers<[1], [0], [0], [1], [0, 0, 1, 1], [], []>} : vector<8x8xf32>, vector<8x128xf32>, vector<8x128xf32> -> vector<8x128xf32>
    %c0_42 = arith.constant 0 : index
    %c0_43 = arith.constant 0 : index
    %97 = vector.load %arg11[%c0_42, %c0_43] : memref<8x1xf32, #tpu.memory_space<vmem>>, vector<8x1xf32>
    %98 = vector.broadcast %97 : vector<8x1xf32> to vector<8x128xf32>
    %99 = arith.addf %96, %98 : vector<8x128xf32>
    %c0_44 = arith.constant 0 : index
    %c0_45 = arith.constant 0 : index
    %100 = vector.load %arg12[%c0_44, %c0_45] : memref<8x128xf32, #tpu.memory_space<vmem>>, vector<8x128xf32>
    tpu.vector_store %arg12[%c0_44, %c0_45], %99 {strides = array<i32>} : memref<8x128xf32, #tpu.memory_space<vmem>>, vector<8x128xf32>,
    return
  }
  func.func @transform_0(%arg0: i32) -> (i32, i32, i32) {
    %c0_i32 = arith.constant 0 : i32
    %c0_i32_0 = arith.constant 0 : i32
    %c0_i32_1 = arith.constant 0 : i32
    return %arg0, %c0_i32, %c0_i32_0 : i32, i32, i32
  }
  func.func @transform_1(%arg0: i32) -> (i32, i32) {
    %c0_i32 = arith.constant 0 : i32
    %c0_i32_0 = arith.constant 0 : i32
    %c0_i32_1 = arith.constant 0 : i32
    return %c0_i32, %c0_i32_0 : i32, i32
  }
  func.func @transform_2(%arg0: i32) -> (i32, i32) {
    %c0_i32 = arith.constant 0 : i32
    %c0_i32_0 = arith.constant 0 : i32
    %c0_i32_1 = arith.constant 0 : i32
    return %c0_i32, %c0_i32_0 : i32, i32
  }
  func.func @transform_3(%arg0: i32) -> (i32, i32) {
    %c0_i32 = arith.constant 0 : i32
    %c0_i32_0 = arith.constant 0 : i32
    %c0_i32_1 = arith.constant 0 : i32
    return %c0_i32, %c0_i32_0 : i32, i32
  }
  func.func @transform_4(%arg0: i32) -> (i32, i32) {
    %c0_i32 = arith.constant 0 : i32
    %c0_i32_0 = arith.constant 0 : i32
    %c0_i32_1 = arith.constant 0 : i32
    return %c0_i32, %c0_i32_0 : i32, i32
  }
  func.func @transform_5(%arg0: i32) -> (i32, i32) {
    %c0_i32 = arith.constant 0 : i32
    %c0_i32_0 = arith.constant 0 : i32
    %c0_i32_1 = arith.constant 0 : i32
    return %c0_i32, %c0_i32_0 : i32, i32
  }
  func.func @transform_6(%arg0: i32) -> (i32, i32) {
    %c0_i32 = arith.constant 0 : i32
    %c0_i32_0 = arith.constant 0 : i32
    %c0_i32_1 = arith.constant 0 : i32
    return %c0_i32, %c0_i32_0 : i32, i32
  }
  func.func @transform_7(%arg0: i32) -> (i32, i32) {
    %c0_i32 = arith.constant 0 : i32
    %c0_i32_0 = arith.constant 0 : i32
    %c0_i32_1 = arith.constant 0 : i32
    return %c0_i32, %c0_i32_0 : i32, i32
  }
  func.func @transform_8(%arg0: i32) -> (i32, i32) {
    %c0_i32 = arith.constant 0 : i32
    %c0_i32_0 = arith.constant 0 : i32
    %c0_i32_1 = arith.constant 0 : i32
    return %c0_i32, %c0_i32_0 : i32, i32
  }
  func.func @transform_9(%arg0: i32) -> (i32, i32) {
    %c0_i32 = arith.constant 0 : i32
    %c0_i32_0 = arith.constant 0 : i32
    %c0_i32_1 = arith.constant 0 : i32
    return %c0_i32, %c0_i32_0 : i32, i32
  }
  func.func @transform_10(%arg0: i32) -> (i32, i32) {
    %c0_i32 = arith.constant 0 : i32
    %c0_i32_0 = arith.constant 0 : i32
    %c0_i32_1 = arith.constant 0 : i32
    return %c0_i32, %c0_i32_0 : i32, i32
  }
  func.func @transform_11(%arg0: i32) -> (i32, i32) {
    %c0_i32 = arith.constant 0 : i32
    %c0_i32_0 = arith.constant 0 : i32
    return %c0_i32, %arg0 : i32, i32
  }
}

</mosaic_0001>

<bundles_post_ra>
// kernel: tpu_custom_call.1
= control target key start
LH: loop header
LB: loop body
LE: loop exit
PB: predicated region body
PF: predicated region fallthrough
CT: control target
= control target key end

     0   :  { %16 = vsyncpa [#allocation3], 0  ;;  %s1872_s0 = inlined_call_operand.vmem [shape: bf16[1,4,2048], index: 0, kind: input, shape index: {}]   ;;  %s1873_s1 = inlined_call_operand.hbm [shape: bf16[16,20], index: 1, kind: input, shape index: {}]   ;;  %s1874_s2 = inlined_call_operand.hbm [shape: bf16[8,16], index: 2, kind: input, shape index: {}]   ;;  %s1875_s3 = inlined_call_operand.vmem [shape: f32[8,1], index: 3, kind: input, shape index: {}]   ;;  %s1876_s4 = inlined_call_operand.vmem [shape: f32[5,8], index: 4, kind: input, shape index: {}]   ;;  %s1877_s5 = inlined_call_operand.hbm [shape: f32[8,5], index: 5, kind: input, shape index: {}]   ;;  %s1878_s6 = inlined_call_operand.vmem [shape: f32[8,1], index: 6, kind: input, shape index: {}]   ;;  %s1879_s7 = inlined_call_operand.vmem [shape: f32[8,8], index: 7, kind: input, shape index: {}]   ;;  %s1880_s8 = inlined_call_operand.vmem [shape: f32[8,1], index: 8, kind: input, shape index: {}]   ;;  %s1881_s9 = inlined_call_operand.hbm [shape: f32[8,8], index: 9, kind: input, shape index: {}]   ;;  %s1882_s10 = inlined_call_operand.vmem [shape: f32[8,1], index: 10, kind: input, shape index: {}]   ;;  %s1883_s11 = inlined_call_operand.hbm [shape: f32[8,128], index: 11, kind: output, shape index: {}]  }
   0x1   :  { %17 = vsyncpa [#allocation6], 0 }
   0x2   :  { %18 = vsyncpa [#allocation9], 0 }
   0x3   :  { %19 = vsyncpa [#allocation4], 0  ;;  %s1597_s17 = smov [#allocation5]   ;;  %s1598_s19 = smov [#allocation2]  }
   0x4   :  { %s40_s18 = sshll.u32 %s1597_s17, 4  ;;  %s27_s20 = sshll.u32 %s1598_s19, 4  ;;  %s41_s18 = int_to_ptr.vmem [resolvable:$true] %s40_s18  ;;  %s28_s20 = int_to_ptr.vmem [resolvable:$true] %s27_s20 }
   0x5   :  { %s1497_s21 = scalar_lea.vmem %s41_s18, 64  ;;  %p1502_p1 = scmp.lt.s32.totalorder %s41_s18, %s41_s18 }
   0x6   :  { %p1498_p0 = scmp.ne.s32.totalorder %s41_s18, %s1497_s21  ;;  %p1503_p2 = scmp.lt.s32.totalorder %s1497_s21, %s1497_s21 }
   0x8   :  { %p1504_p3 = por %p1503_p2, %p1502_p1 }
   0xa   :  { %p1505_p4 = pnand %p1504_p3, %p1498_p0 }
   0xc   :  { %1508 = shalt.err (!%p1505_p4)
}
   0xd   :  { %43 = dma.hbm_to_vmem [thread:$0]  %s1874_s2, 64, %s41_s18, [#allocation6]  }
   0xe   :  { %s1517_s24 = scalar_lea.vmem %s28_s20, 128  ;;  %p1522_p6 = scmp.lt.s32.totalorder %s28_s20, %s28_s20 }
   0xf   :  { %p1518_p5 = scmp.ne.s32.totalorder %s28_s20, %s1517_s24  ;;  %p1523_p7 = scmp.lt.s32.totalorder %s1517_s24, %s1517_s24 }
  0x11   :  { %p1524_p8 = por %p1523_p7, %p1522_p6 }
  0x13   :  { %p1525_p9 = pnand %p1524_p8, %p1518_p5 }
  0x15   :  { %1528 = shalt.err (!%p1525_p9)
}
  0x16   :  { %s1599_s25 = smov 64   ;;  %s1600_s26 = smov 4  }
  0x17   :  { %33 = dma.hbm_to_vmem [thread:$0]  %s1873_s1, 128, %s28_s20, [#allocation3], %s1599_s25, %s1599_s25, %s1600_s26  }
  0x18   :  { %s1601_s29 = smov [#allocation7]   ;;  %s1602_s12 = smov [#allocation8]  }
  0x19   :  { %s54_s30 = sshll.u32 %s1601_s29, 4  ;;  %s70_s13 = sshll.u32 %s1602_s12, 4  ;;  %s55_s30 = int_to_ptr.vmem [resolvable:$true] %s54_s30  ;;  %s71_s13 = int_to_ptr.vmem [resolvable:$true] %s70_s13 }
  0x1a   :  { %s1537_s2 = scalar_lea.vmem %s55_s30, 128  ;;  %p1542_p11 = scmp.lt.s32.totalorder %s55_s30, %s55_s30 }
  0x1b   :  { %p1538_p10 = scmp.ne.s32.totalorder %s55_s30, %s1537_s2  ;;  %p1543_p12 = scmp.lt.s32.totalorder %s1537_s2, %s1537_s2 }
  0x1d   :  { %p1544_p13 = por %p1543_p12, %p1542_p11 }
  0x1f   :  { %p1545_p0 = pnand %p1544_p13, %p1538_p10 }
  0x21   :  { %1548 = shalt.err (!%p1545_p0)
}
  0x22   :  { %57 = dma.hbm_to_vmem [thread:$0]  %s1877_s5, 128, %s55_s30, [#allocation6]  }
  0x23   :  { %s1557_s16 = scalar_lea.vmem %s71_s13, 128  ;;  %p1562_p2 = scmp.lt.s32.totalorder %s71_s13, %s71_s13 }
  0x24   :  { %p1558_p1 = scmp.ne.s32.totalorder %s71_s13, %s1557_s16  ;;  %p1563_p3 = scmp.lt.s32.totalorder %s1557_s16, %s1557_s16 }
  0x26   :  { %p1564_p4 = por %p1563_p3, %p1562_p2 }
  0x28   :  { %p1565_p5 = pnand %p1564_p4, %p1558_p1 }
  0x2a   :  { %1568 = shalt.err (!%p1565_p5)
}
  0x2b   :  { %73 = dma.hbm_to_vmem [thread:$0]  %s1881_s9, 128, %s71_s13, [#allocation9]  }
  0x2c   :  { %1589 = dma.done.wait [#allocation3], 128  }
  0x2d   :  { %1590 = vsyncadd [#allocation3], 4294967168 }
  0x2e   :  { %1591 = dma.done.wait [#allocation6], 192  }
  0x2f   :  { %1592 = vsyncadd [#allocation6], 4294967104 }
  0x30   :  { %1593 = dma.done.wait [#allocation9], 128  }
  0x31   :  { %1594 = vsyncadd [#allocation9], 4294967168  ;;  %v100_v0 = vlaneseq  ;;  %v1603_v1 = vmov 1983009808   ;;  %v1604_v4 = vmov 0   ;;  %v90_v7 = vld [vmem:[%s1872_s0 + $0x8] sm:$0xff] }
  0x32   :  { %v98_v2 = vunpack.c.l.s4 %v1603_v1  ;;  %358 = vmatprep.mubr.bf16.mxu0 %v1604_v4  ;;  %401 = vmatprep.mubr.bf16.mxu1 %v1604_v4  ;;  %vm209_vm0 = vcmask 1041408   ;;  %v91_v8 = vld [vmem:[%s1872_s0 + $0x10] sm:$0xff]  ;;  %v89_v9 = vld [vmem:[%s1872_s0] sm:$0xff]  ;;  %vm240_vm1 = vcmask 1043456   ;;  %vm260_vm2 = vcmask 1045504   ;;  %v92_v55 = vld [vmem:[%s1872_s0 + $0x18] sm:$0xff] }
  0x33   :  { %v1680_v3 = vshrl.u32 %v100_v0, 7  ;;  %1400 = vset.pattern.permute.xlu0 %v1604_v4  ;;  %1401 = vset.pattern.permute.xlu1 %v1604_v4  ;;  %v113_v11 = vcombine.high %v90_v7, %v90_v7  ;;  %v130_v12 = vcombine.high %v91_v8, %v91_v8  ;;  %v166_v14 = vcombine.low %v91_v8, %v91_v8  ;;  %v1743_v51 = vld [vmem:[#allocation2] sm:$0xff]  }
  0x34   :  { %v99_v5 = vunpack.c.0.s8 %v98_v2  ;;  %v96_v15 = vcombine.high %v89_v9, %v89_v9  ;;  %v157_v17 = vcombine.low %v90_v7, %v90_v7  ;;  %v148_v21 = vcombine.low %v89_v9, %v89_v9 }
  0x35   :  { %vm295_vm3 = vcmask 162816   ;;  %vm675_vm4 = vcmask 130048   ;;  %vm1606_vm5 = vmmov 0   ;;  %vm973_vm6 = vcmask 64512  }
  0x36   :  { %v1687_v6 = vsub.s32 %v99_v5, %v1680_v3  ;;  %vm1049_vm7 = vcmp.ne.s32.totalorder %v1680_v3, 0  ;;  %vm1051_vm8 = vcmask 1044480   ;;  %vm1075_vm9 = vcmask 39936  }
  0x38   :  { %v1699_v10 = vrot.slane %v90_v7, %v1687_v6  ;;  %v1702_v13 = vrot.slane %v91_v8, %v1687_v6  ;;  %v103_v16 = vrot.slane %v89_v9, %v1687_v6  ;;  %v127_v20 = vrot.slane %v113_v11, %v1687_v6 }
  0x39   :  { %v1711_v22 = vrot.slane %v166_v14, %v1687_v6  ;;  %v110_v23 = vrot.slane %v96_v15, %v1687_v6  ;;  %v164_v25 = vrot.slane %v157_v17, %v1687_v6  ;;  %v155_v28 = vrot.slane %v148_v21, %v1687_v6 }
  0x3a   :  { %v128_v18 = vcombine.high %v1699_v10, %v1699_v10  ;;  %v299_v19 = vsel %vm209_vm0, %v1699_v10, 0  ;;  %v111_v24 = vcombine.high %v103_v16, %v103_v16  ;;  %v129_v26 = vcombine.high %v127_v20, %v127_v20 }
  0x3b   :  { %v303_v27 = vsel %vm209_vm0, %v127_v20, 0  ;;  %v191_v29 = vcombine.low %v1699_v10, %v1699_v10  ;;  %v196_v30 = vcombine.low %v164_v25, %v164_v25  ;;  %v190_v32 = vcombine.low %v110_v23, %v110_v23 }
  0x3c   :  { %1337 = vmatprep.subr.msk.bf16.mxu0 %vm209_vm0, %v128_v18  ;;  %v214_v31 = vsel %vm209_vm0, %v111_v24, %v103_v16  ;;  %v112_v33 = vcombine.high %v110_v23, %v110_v23  ;;  %v229_v34 = vsel %vm209_vm0, %v129_v26, %v1711_v22  ;;  %1339 = vmatprep.subr.msk.bf16.mxu1 %vm209_vm0, %v129_v26  ;;  %v307_v45 = vsel %vm209_vm0, %v1702_v13, 0 }
  0x3d   :  { %339 = vmatpush1.bf16.msra.mxu0 %v299_v19  ;;  %v243_v35 = vsel %vm240_vm1, %v214_v31, %v110_v23  ;;  %v156_v36 = vcombine.high %v155_v28, %v155_v28  ;;  %v216_v37 = vsel %vm209_vm0, %v110_v23, %v111_v24  ;;  %382 = vmatpush1.bf16.msra.mxu1 %v303_v27 }
  0x3e   :  { %v264_v38 = vsel %vm260_vm2, %v243_v35, %v196_v30  ;;  %v219_v39 = vsel %vm209_vm0, %v112_v33, %v164_v25  ;;  %v245_v40 = vsel %vm240_vm1, %v216_v37, %v191_v29  ;;  %v145_v41 = vcombine.high %v1702_v13, %v1702_v13  ;;  %v1069_v33 = vld [vmem:[%s1878_s6] sm:$0xff] }
  0x3f   :  { %340 = vmatprep.subr.bf16.mxu0 %v264_v38  ;;  %v212_v42 = vsel %vm209_vm0, %v103_v16, %v156_v36  ;;  %v246_v43 = vsel %vm240_vm1, %v219_v39, %v1699_v10  ;;  %v266_v44 = vsel %vm260_vm2, %v245_v40, %v164_v25  ;;  %v144_v48 = vrot.slane %v130_v12, %v1687_v6 }
  0x40   :  { %v242_v46 = vsel %vm240_vm1, %v212_v42, %v190_v32  ;;  %v268_v47 = vsel %vm260_vm2, %v246_v43, %v191_v29  ;;  %v197_v49 = vcombine.low %v1711_v22, %v1711_v22  ;;  %v224_v52 = vsel %vm209_vm0, %v128_v18, %v1699_v10 }
  0x41   :  { %v261_v50 = vsel %vm260_vm2, %v242_v46, %v103_v16  ;;  %383 = vmatprep.subr.bf16.mxu1 %v268_v47  ;;  %v165_v53 = vcombine.high %v164_v25, %v164_v25  ;;  %v192_v54 = vcombine.low %v127_v20, %v127_v20  ;;  %v146_v56 = vcombine.high %v144_v48, %v144_v48 }
  0x42   :  { %341 = vmatpush1.bf16.msra.mxu0 %v261_v50  ;;  %384 = vmatpush1.bf16.msra.mxu1 %v266_v44  ;;  %v311_v57 = vsel %vm209_vm0, %v144_v48, 0  ;;  %v249_v58 = vsel %vm240_vm1, %v224_v52, %v127_v20  ;;  %v193_v59 = vcombine.low %v1702_v13, %v1702_v13  ;;  %v252_v62 = vsel %vm240_vm1, %v229_v34, %v1702_v13 }
  0x43   :  { %1341 = vmatprep.subr.msk.bf16.mxu0 %vm209_vm0, %v145_v41  ;;  %v273_v60 = vsel %vm260_vm2, %v249_v58, %v197_v49  ;;  %v222_v61 = vsel %vm209_vm0, %v1699_v10, %v165_v53  ;;  %v226_v63 = vsel %vm209_vm0, %v127_v20, %v128_v18  ;;  %1343 = vmatprep.subr.msk.bf16.mxu1 %vm209_vm0, %v146_v56 }
  0x44   :  { %v248_v0 = vsel %vm240_vm1, %v222_v61, %v192_v54  ;;  %v277_v1 = vsel %vm260_vm2, %v252_v62, %v193_v59  ;;  %v251_v2 = vsel %vm240_vm1, %v226_v63, %v193_v59  ;;  %v189_v5 = vrot.slane %v92_v55, %v1687_v6 }
  0x45   :  { %1338 = vmatmul.mubr.msk.bf16.vlgmr.msra.gmra.mxu0 %vm295_vm3, %v1743_v51  ;;  %1340 = vmatmul.mubr.msk.bf16.vlgmr.msra.gmra.mxu1 %vm295_vm3, %v1743_v51  ;;  %v270_v7 = vsel %vm260_vm2, %v248_v0, %v1699_v10  ;;  %v199_v8 = vcombine.high %v92_v55, %v92_v55  ;;  %v275_v9 = vsel %vm260_vm2, %v251_v2, %v1711_v22 }
  0x46   :  { %425 = vmatpush1.bf16.msra.mxu0 %v307_v45  ;;  %468 = vmatpush1.bf16.msra.mxu1 %v311_v57  ;;  %v175_v11 = vcombine.low %v92_v55, %v92_v55  ;;  %v234_v12 = vsel %vm209_vm0, %v145_v41, %v1702_v13  ;;  %v207_v14 = vcombine.high %v189_v5, %v189_v5  ;;  %v315_v25 = vsel %vm209_vm0, %v189_v5, 0 }
  0x47   :  { %426 = vmatprep.subr.bf16.mxu0 %v273_v60  ;;  %469 = vmatprep.subr.bf16.mxu1 %v277_v1  ;;  %v206_v15 = vrot.slane %v199_v8, %v1687_v6  ;;  %v174_v16 = vcombine.high %v1711_v22, %v1711_v22  ;;  %v194_v17 = vcombine.low %v144_v48, %v144_v48 }
  0x48   :  { %444 = vmatprep.mubr.bf16.mxu0 %v1604_v4  ;;  %487 = vmatprep.mubr.bf16.mxu1 %v1604_v4  ;;  %v182_v10 = vrot.slane %v175_v11, %v1687_v6  ;;  %v195_v18 = vcombine.low %v189_v5, %v189_v5  ;;  %v255_v20 = vsel %vm240_vm1, %v234_v12, %v144_v48 }
  0x49   :  { %v208_v19 = vcombine.high %v206_v15, %v206_v15  ;;  %v232_v21 = vsel %vm209_vm0, %v1702_v13, %v174_v16  ;;  %v236_v23 = vsel %vm209_vm0, %v144_v48, %v145_v41  ;;  %v321_v6 = vsel %vm209_vm0, %v206_v15, 0 }
  0x4a   :  { %427 = vmatpush1.bf16.msra.mxu0 %v270_v7  ;;  %470 = vmatpush1.bf16.msra.mxu1 %v275_v9  ;;  %v198_v24 = vcombine.low %v182_v10, %v182_v10  ;;  %v239_v22 = vsel %vm209_vm0, %v146_v56, %v182_v10  ;;  %v254_v28 = vsel %vm240_vm1, %v232_v21, %v194_v17 }
  0x4b   :  { %1345 = vmatprep.subr.msk.bf16.mxu0 %vm209_vm0, %v207_v14  ;;  %1347 = vmatprep.subr.msk.bf16.mxu1 %vm209_vm0, %v208_v19  ;;  %v259_v26 = vsel %vm240_vm1, %v239_v22, %v189_v5  ;;  %v257_v30 = vsel %vm240_vm1, %v236_v23, %v195_v18  ;;  %v279_v31 = vsel %vm260_vm2, %v254_v28, %v1702_v13  ;;  %v669_v13 = vld [vmem:[%s1875_s3] sm:$0xff] }
  0x4c   :  { %v282_v27 = vsel %vm260_vm2, %v255_v20, %v198_v24  ;;  %v286_v29 = vsel %vm260_vm2, %v259_v26, %v195_v18  ;;  %v284_v32 = vsel %vm260_vm2, %v257_v30, %v182_v10  ;;  %672 = vperm.xlu0 %1400, %v669_v13  }
  0x4d   :  { %1342 = vmatmul.mubr.msk.bf16.vlgmr.msra.gmra.mxu0 %vm295_vm3, %v1743_v51  ;;  %1344 = vmatmul.mubr.msk.bf16.vlgmr.msra.gmra.mxu1 %vm295_vm3, %v1743_v51 }
  0x4e   :  { %511 = vmatpush1.bf16.msra.mxu0 %v315_v25  ;;  %554 = vmatpush1.bf16.msra.mxu1 %v321_v6 }
  0x4f   :  { %512 = vmatprep.subr.bf16.mxu0 %v282_v27  ;;  %555 = vmatprep.subr.bf16.mxu1 %v286_v29 }
  0x50   :  { %530 = vmatprep.mubr.bf16.mxu0 %v1604_v4  ;;  %573 = vmatprep.mubr.bf16.mxu1 %v1604_v4 }
  0x51   :  { %1072 = vperm.xlu0 %1400, %v1069_v33  }
  0x52   :  { %513 = vmatpush1.bf16.msra.mxu0 %v279_v31  ;;  %556 = vmatpush1.bf16.msra.mxu1 %v284_v32 }
  0x55   :  { %1346 = vmatmul.mubr.msk.bf16.vlgmr.msra.gmra.mxu0 %vm295_vm3, %v1743_v51  ;;  %1348 = vmatmul.mubr.msk.bf16.vlgmr.msra.gmra.mxu1 %vm295_vm3, %v1743_v51 }
  0x56   :  { %711 = vmatprep.mubr.bf16.mxu0 %v1604_v4  ;;  %752 = vmatprep.mubr.bf16.mxu1 %v1604_v4 }
 0x105   :  { %v360_v34 = vpop.f32.mrf.mxu0  ;;  %v403_v35 = vpop.f32.mrf.mxu1 }
 0x106   :  { %1411 = vtanh.f32 %v360_v34 }
 0x107   :  { %v362_v36 = vpop.f32.mrf.mxu0  ;;  %1413 = vtanh.f32 %v403_v35  ;;  %v405_v37 = vpop.f32.mrf.mxu1 }
 0x108   :  { %1415 = vtanh.f32 %v362_v36  ;;  %v1817_v36 = vld [vmem:[#allocation5] sm:$0xf] }
 0x109   :  { %v364_v38 = vpop.f32.mrf.mxu0  ;;  %1417 = vtanh.f32 %v405_v37  ;;  %v407_v39 = vpop.f32.mrf.mxu1 }
 0x10a   :  { %1419 = vtanh.f32 %v364_v38 }
 0x10b   :  { %v366_v40 = vpop.f32.mrf.mxu0  ;;  %1421 = vtanh.f32 %v407_v39  ;;  %v409_v41 = vpop.f32.mrf.mxu1 }
 0x10c   :  { %1423 = vtanh.f32 %v366_v40 }
 0x10d   :  { %1425 = vtanh.f32 %v409_v41  ;;  %v446_v42 = vpop.f32.mrf.mxu0  ;;  %v489_v43 = vpop.f32.mrf.mxu1 }
 0x10e   :  { %1427 = vtanh.f32 %v446_v42 }
 0x10f   :  { %v448_v44 = vpop.f32.mrf.mxu0  ;;  %1429 = vtanh.f32 %v489_v43  ;;  %v491_v45 = vpop.f32.mrf.mxu1 }
 0x110   :  { %1431 = vtanh.f32 %v448_v44 }
 0x111   :  { %v450_v46 = vpop.f32.mrf.mxu0  ;;  %1433 = vtanh.f32 %v491_v45  ;;  %v493_v47 = vpop.f32.mrf.mxu1 }
 0x112   :  { %1435 = vtanh.f32 %v450_v46 }
 0x113   :  { %v1412_v48 = vpop.eup %1411  ;;  %v452_v49 = vpop.f32.mrf.mxu0  ;;  %1437 = vtanh.f32 %v493_v47 }
 0x114   :  { %v495_v50 = vpop.f32.mrf.mxu1  ;;  %v1414_v51 = vpop.eup %1413  ;;  %1439 = vtanh.f32 %v452_v49  ;;  %v608_v63 = vadd.f32 1.0, %v1412_v48 }
 0x115   :  { %v1416_v52 = vpop.eup %1415  ;;  %1441 = vtanh.f32 %v495_v50  ;;  %v532_v53 = vpop.f32.mrf.mxu0  ;;  %v610_v8 = vadd.f32 1.0, %v1414_v51 }
 0x116   :  { %v575_v54 = vpop.f32.mrf.mxu1  ;;  %v1418_v55 = vpop.eup %1417  ;;  %1443 = vtanh.f32 %v532_v53  ;;  %v609_v60 = vadd.f32 1.0, %v1416_v52  ;;  %v632_v21 = vmul.f32 0.5, %v608_v63 }
 0x117   :  { %v1420_v56 = vpop.eup %1419  ;;  %v534_v57 = vpop.f32.mrf.mxu0  ;;  %1445 = vtanh.f32 %v575_v54  ;;  %v611_v0 = vadd.f32 1.0, %v1418_v55  ;;  %v634_v25 = vmul.f32 0.5, %v610_v8 }
 0x118   :  { %v577_v58 = vpop.f32.mrf.mxu1  ;;  %v1422_v59 = vpop.eup %1421  ;;  %v620_v61 = vadd.f32 1.0, %v1420_v56  ;;  %1447 = vtanh.f32 %v534_v57  ;;  %v633_v17 = vmul.f32 0.5, %v609_v60 }
 0x119   :  { %v1424_v62 = vpop.eup %1423  ;;  %v622_v1 = vadd.f32 1.0, %v1422_v59  ;;  %v536_v2 = vpop.f32.mrf.mxu0  ;;  %1449 = vtanh.f32 %v577_v58  ;;  %v635_v23 = vmul.f32 0.5, %v611_v0 }
 0x11a   :  { %v579_v5 = vpop.f32.mrf.mxu1  ;;  %v1426_v7 = vpop.eup %1425  ;;  %v621_v9 = vadd.f32 1.0, %v1424_v62  ;;  %1451 = vtanh.f32 %v536_v2  ;;  %v644_v12 = vmul.f32 0.5, %v620_v61 }
 0x11b   :  { %v1428_v11 = vpop.eup %1427  ;;  %v623_v14 = vadd.f32 1.0, %v1426_v7  ;;  %v538_v15 = vpop.f32.mrf.mxu0  ;;  %1453 = vtanh.f32 %v579_v5  ;;  %v646_v19 = vmul.f32 0.5, %v622_v1 }
 0x11c   :  { %v581_v16 = vpop.f32.mrf.mxu1  ;;  %v1430_v10 = vpop.eup %1429  ;;  %v645_v18 = vmul.f32 0.5, %v621_v9  ;;  %1455 = vtanh.f32 %v538_v15  ;;  %v656_v27 = vpack.c.bf16 %v644_v12, %v632_v21  ;;  %v612_v33 = vadd.f32 1.0, %v1428_v11 }
 0x11d   :  { %v1432_v20 = vpop.eup %1431  ;;  %v647_v24 = vmul.f32 0.5, %v623_v14  ;;  %1457 = vtanh.f32 %v581_v16  ;;  %v658_v30 = vpack.c.bf16 %v646_v19, %v634_v25  ;;  %v614_v38 = vadd.f32 1.0, %v1430_v10 }
 0x11e   :  { %v1434_v22 = vpop.eup %1433  ;;  %v657_v6 = vpack.c.bf16 %v645_v18, %v633_v17  ;;  %v613_v31 = vadd.f32 1.0, %v1432_v20  ;;  %v636_v48 = vmul.f32 0.5, %v612_v33  ;;  %v1605_v21 = vmov 0.0  }
 0x11f   :  { %v1436_v26 = vpop.eup %1435  ;;  %v659_v28 = vpack.c.bf16 %v647_v24, %v635_v23  ;;  %v615_v34 = vadd.f32 1.0, %v1434_v22  ;;  %v638_v52 = vmul.f32 0.5, %v614_v38 }
 0x120   :  { %v1438_v29 = vpop.eup %1437  ;;  %v624_v32 = vadd.f32 1.0, %v1436_v26  ;;  %693 = vmatprep.subr.bf16.mxu0 %v657_v6  ;;  %v637_v44 = vmul.f32 0.5, %v613_v31 }
 0x121   :  { %v1440_v13 = vpop.eup %1439  ;;  %v626_v35 = vadd.f32 1.0, %v1438_v29  ;;  %694 = vmatpush1.bf16.msra.mxu0 %v656_v27  ;;  %734 = vmatprep.subr.bf16.mxu1 %v659_v28  ;;  %v639_v49 = vmul.f32 0.5, %v615_v34 }
 0x122   :  { %v1442_v37 = vpop.eup %1441  ;;  %v625_v39 = vadd.f32 1.0, %v1440_v13  ;;  %735 = vmatpush1.bf16.msra.mxu1 %v658_v30  ;;  %v648_v41 = vmul.f32 0.5, %v624_v32 }
 0x123   :  { %v1444_v40 = vpop.eup %1443  ;;  %v627_v42 = vadd.f32 1.0, %v1442_v37  ;;  %v650_v46 = vmul.f32 0.5, %v626_v35 }
 0x124   :  { %v1446_v43 = vpop.eup %1445  ;;  %v649_v45 = vmul.f32 0.5, %v625_v39  ;;  %1349 = vmatmul.mubr.msk.bf16.vlgmr.msra.gmra.mxu0 %vm675_vm4, %v1817_v36  ;;  %v660_v55 = vpack.c.bf16 %v648_v41, %v636_v48  ;;  %v616_v62 = vadd.f32 1.0, %v1444_v40 }
 0x125   :  { %v1448_v47 = vpop.eup %1447  ;;  %v651_v50 = vmul.f32 0.5, %v627_v42  ;;  %1350 = vmatmul.mubr.msk.bf16.vlgmr.msra.gmra.mxu1 %vm675_vm4, %v1817_v36  ;;  %793 = vmatprep.mubr.bf16.mxu0 %v1604_v4  ;;  %v662_v58 = vpack.c.bf16 %v650_v46, %v638_v52  ;;  %v618_v2 = vadd.f32 1.0, %v1446_v43 }
 0x126   :  { %v1450_v51 = vpop.eup %1449  ;;  %v661_v53 = vpack.c.bf16 %v649_v45, %v637_v44  ;;  %834 = vmatprep.mubr.bf16.mxu1 %v1604_v4  ;;  %v617_v59 = vadd.f32 1.0, %v1448_v47  ;;  %v640_v14 = vmul.f32 0.5, %v616_v62 }
 0x127   :  { %v1452_v54 = vpop.eup %1451  ;;  %v663_v56 = vpack.c.bf16 %v651_v50, %v639_v49  ;;  %v619_v63 = vadd.f32 1.0, %v1450_v51  ;;  %v642_v10 = vmul.f32 0.5, %v618_v2 }
 0x128   :  { %v1454_v57 = vpop.eup %1453  ;;  %v628_v60 = vadd.f32 1.0, %v1452_v54  ;;  %775 = vmatprep.subr.bf16.mxu0 %v661_v53  ;;  %v641_v9 = vmul.f32 0.5, %v617_v59 }
 0x129   :  { %v1456_v61 = vpop.eup %1455  ;;  %v630_v0 = vadd.f32 1.0, %v1454_v57  ;;  %776 = vmatpush1.bf16.msra.mxu0 %v660_v55  ;;  %816 = vmatprep.subr.bf16.mxu1 %v663_v56  ;;  %v643_v15 = vmul.f32 0.5, %v619_v63 }
 0x12a   :  { %v1458_v1 = vpop.eup %1457  ;;  %v629_v5 = vadd.f32 1.0, %v1456_v61  ;;  %817 = vmatpush1.bf16.msra.mxu1 %v662_v58  ;;  %v652_v7 = vmul.f32 0.5, %v628_v60 }
 0x12b   :  { %v631_v8 = vadd.f32 1.0, %v1458_v1  ;;  %v654_v12 = vmul.f32 0.5, %v630_v0 }
 0x12c   :  { %v653_v11 = vmul.f32 0.5, %v629_v5  ;;  %1351 = vmatmul.mubr.msk.bf16.vlgmr.msra.gmra.mxu0 %vm675_vm4, %v1817_v36  ;;  %v664_v18 = vpack.c.bf16 %v652_v7, %v640_v14 }
 0x12d   :  { %v655_v16 = vmul.f32 0.5, %v631_v8  ;;  %1352 = vmatmul.mubr.msk.bf16.vlgmr.msra.gmra.mxu1 %vm675_vm4, %v1817_v36  ;;  %875 = vmatprep.mubr.bf16.mxu0 %v1604_v4  ;;  %v666_v20 = vpack.c.bf16 %v654_v12, %v642_v10 }
 0x12e   :  { %v665_v17 = vpack.c.bf16 %v653_v11, %v641_v9  ;;  %916 = vmatprep.mubr.bf16.mxu1 %v1604_v4  ;;  %v673_v4 = vpop.permute.xlu0 %672 }
 0x12f   :  { %v667_v19 = vpack.c.bf16 %v655_v16, %v643_v15 }
 0x130   :  { %857 = vmatprep.subr.bf16.mxu0 %v665_v17 }
 0x131   :  { %858 = vmatpush1.bf16.msra.mxu0 %v664_v18  ;;  %898 = vmatprep.subr.bf16.mxu1 %v667_v19 }
 0x132   :  { %899 = vmatpush1.bf16.msra.mxu1 %v666_v20  ;;  %1369 = vmatprep.subr.mxu0 %v1605_v21  ;;  %v1073_v3 = vpop.permute.xlu0 %1072 }
 0x133   :  { %1374 = vmatprep.subr.mxu1 %v1605_v21 }
 0x134   :  { %1353 = vmatmul.mubr.msk.bf16.vlgmr.msra.gmra.mxu0 %vm675_vm4, %v1817_v36 }
 0x135   :  { %1354 = vmatmul.mubr.msk.bf16.vlgmr.msra.gmra.mxu1 %vm675_vm4, %v1817_v36  ;;  %1371 = vmatprep.mubr.msk.f32.mxu0 %vm1606_vm5, %v1605_v21 }
 0x136   :  { %1376 = vmatprep.mubr.msk.f32.mxu1 %vm1606_vm5, %v1605_v21 }
 0x1e4   :  { %v713_v23 = vpop.f32.mrf.mxu0 }
 0x1e5   :  { %v714_v24 = vadd.f32 %v713_v23, %v673_v4  ;;  %v754_v22 = vpop.f32.mrf.mxu1 }
 0x1e6   :  { %v715_v25 = vpop.f32.mrf.mxu0  ;;  %v755_v6 = vadd.f32 %v754_v22, %v673_v4 }
 0x1e7   :  { %1459 = vtanh.f32 %v714_v24  ;;  %v716_v26 = vadd.f32 %v715_v25, %v673_v4  ;;  %v756_v27 = vpop.f32.mrf.mxu1 }
 0x1e8   :  { %1461 = vtanh.f32 %v755_v6  ;;  %v717_v28 = vpop.f32.mrf.mxu0  ;;  %v757_v29 = vadd.f32 %v756_v27, %v673_v4 }
 0x1e9   :  { %1463 = vtanh.f32 %v716_v26  ;;  %v758_v30 = vpop.f32.mrf.mxu1 }
 0x1ea   :  { %1465 = vtanh.f32 %v757_v29  ;;  %v718_v31 = vpop.f32.mrf.mxu0 }
 0x1eb   :  { %v759_v32 = vpop.f32.mrf.mxu1 }
 0x1ec   :  { %v795_v13 = vpop.f32.mrf.mxu0 }
 0x1ed   :  { %v796_v33 = vadd.f32 %v795_v13, %v673_v4  ;;  %v836_v34 = vpop.f32.mrf.mxu1 }
 0x1ee   :  { %v797_v35 = vpop.f32.mrf.mxu0  ;;  %v837_v36 = vadd.f32 %v836_v34, %v673_v4 }
 0x1ef   :  { %1467 = vtanh.f32 %v796_v33  ;;  %v798_v37 = vadd.f32 %v797_v35, %v673_v4  ;;  %v838_v38 = vpop.f32.mrf.mxu1 }
 0x1f0   :  { %1469 = vtanh.f32 %v837_v36  ;;  %v799_v39 = vpop.f32.mrf.mxu0  ;;  %v839_v40 = vadd.f32 %v838_v38, %v673_v4 }
 0x1f1   :  { %1471 = vtanh.f32 %v798_v37  ;;  %v840_v41 = vpop.f32.mrf.mxu1 }
 0x1f2   :  { %1473 = vtanh.f32 %v839_v40  ;;  %v800_v42 = vpop.f32.mrf.mxu0  ;;  %v972_v41 = vld [vmem:[%s1876_s4] sm:$0x1f] }
 0x1f3   :  { %v841_v43 = vpop.f32.mrf.mxu1 }
 0x1f4   :  { %v1460_v44 = vpop.eup %1459  ;;  %v877_v45 = vpop.f32.mrf.mxu0 }
 0x1f5   :  { %v1462_v46 = vpop.eup %1461  ;;  %v937_v47 = vadd.f32 1.0, %v1460_v44  ;;  %v878_v48 = vadd.f32 %v877_v45, %v673_v4  ;;  %v918_v49 = vpop.f32.mrf.mxu1 }
 0x1f6   :  { %v1464_v50 = vpop.eup %1463  ;;  %v879_v51 = vpop.f32.mrf.mxu0  ;;  %v919_v52 = vadd.f32 %v918_v49, %v673_v4  ;;  %v939_v55 = vadd.f32 1.0, %v1462_v46 }
 0x1f7   :  { %v1466_v53 = vpop.eup %1465  ;;  %v938_v54 = vadd.f32 1.0, %v1464_v50  ;;  %1475 = vtanh.f32 %v878_v48  ;;  %v880_v56 = vadd.f32 %v879_v51, %v673_v4  ;;  %v920_v57 = vpop.f32.mrf.mxu1  ;;  %v949_v60 = vmul.f32 0.5, %v937_v47 }
 0x1f8   :  { %1477 = vtanh.f32 %v919_v52  ;;  %v881_v58 = vpop.f32.mrf.mxu0  ;;  %v921_v59 = vadd.f32 %v920_v57, %v673_v4  ;;  %v940_v62 = vadd.f32 1.0, %v1466_v53  ;;  %v951_v2 = vmul.f32 0.5, %v939_v55 }
 0x1f9   :  { %v950_v61 = vmul.f32 0.5, %v938_v54  ;;  %1479 = vtanh.f32 %v880_v56  ;;  %v922_v63 = vpop.f32.mrf.mxu1 }
 0x1fa   :  { %1481 = vtanh.f32 %v921_v59  ;;  %v882_v0 = vpop.f32.mrf.mxu0  ;;  %v952_v11 = vmul.f32 0.5, %v940_v62  ;;  %v1156_v62 = vld [vmem:[%s1880_s8] sm:$0xff]  ;;  %s1607_s8 = smov [#allocation10]  }
 0x1fb   :  { %v961_v1 = vadd.f32 %v950_v61, %v949_v60  ;;  %v923_v5 = vpop.f32.mrf.mxu1  ;;  %v1068_v60 = vld [vmem:[#allocation7] sm:$0xff]  ;;  %1159 = vperm.xlu1 %1401, %v1156_v62   ;;  %v1239_v63 = vld [vmem:[%s1882_s10] sm:$0xff]  ;;  %s1325_s10 = sshll.u32 %s1607_s8, 4  ;;  %s1326_s10 = int_to_ptr.vmem [resolvable:$true] %s1325_s10 }
 0x1fc   :  { %v1468_v7 = vpop.eup %1467  ;;  %p1574_p7 = scmp.lt.s32.totalorder %s1326_s10, %s1326_s10 }
 0x1fd   :  { %v1470_v8 = vpop.eup %1469  ;;  %v962_v9 = vadd.f32 %v961_v1, %v951_v2  ;;  %v941_v12 = vadd.f32 1.0, %v1468_v7 }
 0x1fe   :  { %v1472_v14 = vpop.eup %1471  ;;  %v943_v18 = vadd.f32 1.0, %v1470_v8 }
 0x1ff   :  { %v1474_v15 = vpop.eup %1473  ;;  %v963_v16 = vadd.f32 %v962_v9, %v952_v11  ;;  %v953_v10 = vmul.f32 0.5, %v941_v12  ;;  %v942_v17 = vadd.f32 1.0, %v1472_v14  ;;  %1242 = vperm.xlu1 %1401, %v1239_v63  }
 0x200   :  { %v944_v4 = vadd.f32 1.0, %v1474_v15  ;;  %v955_v24 = vmul.f32 0.5, %v943_v18 }
 0x201   :  { %v964_v19 = vadd.f32 %v963_v16, %v953_v10  ;;  %v954_v20 = vmul.f32 0.5, %v942_v17  ;;  %v1238_v17 = vld [vmem:[#allocation8] sm:$0xff] }
 0x202   :  { %v956_v26 = vmul.f32 0.5, %v944_v4 }
 0x203   :  { %v965_v23 = vadd.f32 %v964_v19, %v954_v20 }
 0x204   :  { %v1476_v22 = vpop.eup %1475 }
 0x205   :  { %v1478_v25 = vpop.eup %1477  ;;  %v966_v6 = vadd.f32 %v965_v23, %v955_v24  ;;  %v945_v27 = vadd.f32 1.0, %v1476_v22 }
 0x206   :  { %v1480_v28 = vpop.eup %1479  ;;  %v947_v13 = vadd.f32 1.0, %v1478_v25 }
 0x207   :  { %v1482_v29 = vpop.eup %1481  ;;  %v967_v30 = vadd.f32 %v966_v6, %v956_v26  ;;  %v957_v31 = vmul.f32 0.5, %v945_v27  ;;  %v946_v32 = vadd.f32 1.0, %v1480_v28 }
 0x208   :  { %v948_v35 = vadd.f32 1.0, %v1482_v29  ;;  %v959_v37 = vmul.f32 0.5, %v947_v13 }
 0x209   :  { %v968_v33 = vadd.f32 %v967_v30, %v957_v31  ;;  %v958_v34 = vmul.f32 0.5, %v946_v32 }
 0x20a   :  { %v960_v39 = vmul.f32 0.5, %v948_v35 }
 0x20b   :  { %v969_v36 = vadd.f32 %v968_v33, %v958_v34 }
 0x20d   :  { %v970_v38 = vadd.f32 %v969_v36, %v959_v37 }
 0x20f   :  { %v971_v40 = vadd.f32 %v970_v38, %v960_v39 }
 0x211   :  { %1370 = vmatpush3.msra.mxu0 %v971_v40 }
 0x212   :  { %1372 = vmatmul.mubr.msk.f32.vlgmr.msra.gmra.mxu0 %vm973_vm6, %v972_v41  ;;  %1379 = vmatprep.subr.mxu0 %v1605_v21 }
 0x213   :  { %1381 = vmatprep.mubr.msk.f32.mxu0 %vm1606_vm5, %v1605_v21 }
 0x276   :  { %v1160_v9 = vpop.permute.xlu1 %1159 }
 0x27a   :  { %v1243_v18 = vpop.permute.xlu1 %1242 }
 0x2d2   :  { %v1043_v42 = vpop.f32.mrf.mxu0 }
 0x2d3   :  { %v1050_v43 = vsel %vm1049_vm7, %v1043_v42, -inf }
 0x2d4   :  { %v1052_v44 = vsel %vm1051_vm8, %v1050_v43, -inf  ;;  %v1373_v45 = vpop.f32.mrf.mxu0 }
 0x2d5   :  { %v1053_v46 = vrot.slane %v1052_v44, 4 }
 0x2d7   :  { %v1054_v47 = vmax.f32 %v1052_v44, %v1053_v46 }
 0x2d9   :  { %v1055_v48 = vrot.slane %v1054_v47, 2 }
 0x2db   :  { %v1056_v49 = vmax.f32 %v1054_v47, %v1055_v48 }
 0x2dd   :  { %v1057_v50 = vrot.slane %v1056_v49, 1 }
 0x2df   :  { %v1058_v51 = vmax.f32 %v1056_v49, %v1057_v50 }
 0x2e1   :  { %v1059_v52 = vmul.f32 0.99, %v1058_v51 }
 0x2e3   :  { %v1060_v53 = vsub.f32 %v1043_v42, %v1059_v52 }
 0x2e5   :  { %v1061_v54 = vmul.f32 500.0, %v1060_v53 }
 0x2e7   :  { %v1356_v55 = vadd.f32 -1.0, %v1061_v54 }
 0x2e9   :  { %v1063_v56 = vmul.f32 100.0, %v1356_v55 }
 0x2eb   :  { %1483 = vtanh.f32 %v1063_v56 }
 0x2f8   :  { %v1484_v57 = vpop.eup %1483 }
 0x2f9   :  { %v1065_v58 = vadd.f32 1.0, %v1484_v57 }
 0x2fb   :  { %v1066_v59 = vmul.f32 0.5, %v1065_v58 }
 0x2fd   :  { %v1067_v61 = vsel %vm1049_vm7, %v1066_v59, 0.0 }
 0x2fe   :  { %1375 = vmatpush3.msk.msra.mxu1 %vm1051_vm8, %v1067_v61 }
 0x2ff   :  { %1377 = vmatmul.mubr.msk.f32.vlgmr.msra.gmra.mxu1 %vm1075_vm9, %v1068_v60  ;;  %1384 = vmatprep.subr.mxu1 %v1605_v21 }
 0x300   :  { %1386 = vmatprep.mubr.msk.f32.mxu1 %vm1606_vm5, %v1605_v21  ;;  %v1155_v21 = vld [vmem:[%s1879_s7] sm:$0xff]  ;;  %s1569_s7 = scalar_lea.vmem %s1326_s10, 128 }
 0x301   :  { %p1570_p6 = scmp.ne.s32.totalorder %s1326_s10, %s1569_s7  ;;  %p1575_p8 = scmp.lt.s32.totalorder %s1569_s7, %s1569_s7 }
 0x303   :  { %p1576_p9 = por %p1575_p8, %p1574_p7 }
 0x305   :  { %p1577_p10 = pnand %p1576_p9, %p1570_p6 }
 0x3bf   :  { %v1148_v0 = vpop.f32.mrf.mxu1 }
 0x3c0   :  { %v1149_v1 = vadd.f32 %v1148_v0, %v1073_v3 }
 0x3c1   :  { %v1378_v2 = vpop.f32.mrf.mxu1 }
 0x3c2   :  { %1485 = vtanh.f32 %v1149_v1 }
 0x3cf   :  { %v1486_v5 = vpop.eup %1485 }
 0x3d0   :  { %v1153_v7 = vadd.f32 1.0, %v1486_v5 }
 0x3d2   :  { %v1154_v8 = vmul.f32 0.5, %v1153_v7 }
 0x3d4   :  { %1380 = vmatpush3.msra.mxu0 %v1154_v8 }
 0x3d5   :  { %1382 = vmatmul.mubr.msk.f32.vlgmr.msra.gmra.mxu0 %vm973_vm6, %v1155_v21 }
 0x495   :  { %v1231_v11 = vpop.f32.mrf.mxu0 }
 0x496   :  { %v1232_v12 = vadd.f32 %v1231_v11, %v1160_v9 }
 0x497   :  { %v1383_v14 = vpop.f32.mrf.mxu0 }
 0x498   :  { %1487 = vtanh.f32 %v1232_v12 }
 0x4a5   :  { %v1488_v15 = vpop.eup %1487 }
 0x4a6   :  { %v1236_v16 = vadd.f32 1.0, %v1488_v15 }
 0x4a8   :  { %v1237_v10 = vmul.f32 0.5, %v1236_v16 }
 0x4aa   :  { %1385 = vmatpush3.msra.mxu1 %v1237_v10 }
 0x4ab   :  { %1387 = vmatmul.mubr.msk.f32.vlgmr.msra.gmra.mxu1 %vm973_vm6, %v1238_v17 }
 0x56b   :  { %v1314_v19 = vpop.f32.mrf.mxu1 }
 0x56c   :  { %v1315_v20 = vadd.f32 %v1314_v19, %v1243_v18 }
 0x56d   :  { %v1388_v4 = vpop.f32.mrf.mxu1 }
 0x56e   :  { %1318 = vst [vmem:[#allocation10] sm:$0xff] %v1315_v20 }
 0x56f   :  { %1580 = shalt.err (!%p1577_p10)
}
 0x570   :  { %1328 = dma.vmem_to_hbm [thread:$0]  %s1326_s10, 128, %s1883_s11, [#allocation4]  }
 0x571   :  { %1595 = dma.done.wait [#allocation4], 128  }
 0x572   :  { %1596 = vsyncadd [#allocation4], 4294967168 }
 0x573   :  { %1332 = vsyncpa [#allocation3], 1 }
 0x574   :  { %1333 = vsyncpa [#allocation6], 1 }
 0x575   :  { %1334 = vsyncpa [#allocation9], 1 }
 0x576   :  { %1335 = vsyncpa [#allocation4], 1 }

</bundles_post_ra>
